<compile_context>
chip_gen: v6e
topology: v6e:2x2x1
jax: 0.10.0
libtpu: 0.0.40
codegen_flags: <defaults>
</compile_context>

<pallas_src>
import math
import functools

import jax
import jax.numpy as jnp
from jax import lax
from jax.experimental import pallas as pl
from jax.experimental.pallas import tpu as pltpu

_MiB = 1024 * 1024


def _round_up(a, b):
    return (a + b - 1) // b * b


def _vmem_capacity_bytes():
    """Physical per-core VMEM (64 MiB v7x, 128 MiB v5e/v6e); safe fallback."""
    try:
        info = pltpu.get_tpu_info()
        cap = getattr(info, "vmem_capacity_bytes", None)
        if cap:
            return int(cap)
    except Exception:
        pass
    return 64 * _MiB


def _pick_tiles(B, C, D, mm_bytes, vmem_cap):
    # TB follows B (multiple of 8, <=512) so B_pad stays close to B;
    # TC is lane-dense (multiple of 128), grown to 1024 only on 128 MiB parts.
    TB = min(512, _round_up(max(B, 1), 8))
    if C >= 1024 and vmem_cap >= 96 * _MiB:
        TC = 1024
    elif C >= 512:
        TC = 512
    else:
        TC = _round_up(max(C, 1), 128)

    def working_set(tb, tc):
        return (2 * tb * D * mm_bytes        # x tiles (double-buffered)
                + 2 * D * tc * mm_bytes      # W tiles (double-buffered)
                + 2 * tb * tc * 4            # out tiles (double-buffered)
                + 3 * tb * tc * 4            # f32 temporaries (cos/mask/out)
                + 4 * tb * 8)                # xnorm + label tiles

    budget = 0.55 * vmem_cap
    while working_set(TB, TC) > budget and TC > 128:
        TC = max(128, _round_up(TC // 2, 128))
    while working_set(TB, TC) > budget and TB > 8:
        TB = max(8, _round_up(TB // 2, 8))
    # TODO(synk): for very large D (>~8k) add a K grid axis with an f32 VMEM
    # accumulator and run the margin epilogue under pl.when on the last K step.
    return TB, TC


def _sphere_kernel(scale_ref, x_ref, wt_ref, xnorm_ref, label_ref, out_ref, *,
                   m, tc, labeled):
    # scale_ref: (1,1)  f32 SMEM  1/(1+lambda) (runtime scalar -> no recompiles)
    # x_ref:     (TB,D)  bf16/f32 pre-normalized input rows
    # wt_ref:    (D,TC)  bf16/f32 pre-normalized weight, transposed (unit cols)
    # xnorm_ref: (TB,1)  f32      ||x||_2 per row
    # label_ref: (TB,1)  i32      (-1 for padded rows / unlabeled)
    # out_ref:   (TB,TC) f32
    cos = jnp.dot(x_ref[...], wt_ref[...], preferred_element_type=jnp.float32)

    if not labeled:          # inference branch: plain cosine (no clamp in torch)
        out_ref[...] = cos
        return

    cos = jnp.clip(cos, -1.0, 1.0)
    TB, TC = cos.shape

    # Label one-hot: (1,TC) lane iota vs (label - tile column offset); bool mask.
    lab_local = label_ref[...] - pl.program_id(0) * tc            # (TB,1)
    lane = lax.broadcasted_iota(jnp.int32, (1, TC), 1)
    mask = lane == lab_local                                      # (TB,TC) bool

    # cos_theta at the label column (0 if the label lies in another C tile —
    # those rows are masked out of the correction anyway).
    cos_lab = jnp.sum(jnp.where(mask, cos, 0.0), axis=1, keepdims=True)

    # Chebyshev cos(m*theta) on the (TB,1) label column only (Horner form).
    c = cos_lab
    c2 = c * c
    if m == 0:
        cos_m = jnp.ones_like(c)
    elif m == 1:
        cos_m = c
    elif m == 2:
        cos_m = 2.0 * c2 - 1.0
    elif m == 3:
        cos_m = (4.0 * c2 - 3.0) * c
    elif m == 4:
        cos_m = (8.0 * c2 - 8.0) * c2 + 1.0
    else:  # m == 5
        cos_m = ((16.0 * c2 - 20.0) * c2 + 5.0) * c

    # k = floor(m*arccos(c)/pi) without arccos: count thresholds cos(j*pi/m)
    # that c falls below.  (1-ulp ties exactly at theta = j*pi/m are benign.)
    k = jnp.zeros_like(c)
    for jj in range(1, m + 1):
        thr = math.cos(jj * math.pi / m)
        k = k + (c <= thr).astype(jnp.float32)
    parity = k - 2.0 * jnp.floor(0.5 * k)                         # k mod 2
    sign = 1.0 - 2.0 * parity                                     # (-1)**k
    phi_lab = sign * cos_m - 2.0 * k                              # (TB,1)

    xnorm = xnorm_ref[...]                                        # (TB,1)
    corr_xn = (phi_lab - cos_lab) * scale_ref[0, 0] * xnorm       # (TB,1)
    out_ref[...] = cos * xnorm + jnp.where(mask, corr_xn, 0.0)


def sphere_product(x, weight, label, *, m=4, iter_count=1,
                   base=1000.0, gamma=0.12, power=1, lambda_min=5.0,
                   matmul_dtype=jnp.bfloat16):
    """SphereProduct forward (labeled margin branch; label=None -> plain cosine).

    matmul_dtype=jnp.bfloat16 (default) feeds the MXU native bf16 operands with
    f32 accumulation (3-6x faster than emulated f32 matmul, halves x/W DMA);
    pass jnp.float32 for tight comparison with an f32 reference.  The margin
    epilogue is always computed in f32.
    """
    B, D = x.shape
    C, D2 = weight.shape
    assert D == D2 and 0 <= m <= 5

    eps = 1e-12
    mm_dtype = jnp.dtype(matmul_dtype)
    mm_bytes = mm_dtype.itemsize
    vmem_cap = _vmem_capacity_bytes()
    TB, TC = _pick_tiles(B, C, D, mm_bytes, vmem_cap)
    B_pad = _round_up(B, TB)
    C_pad = _round_up(C, TC)

    # Weight: normalize rows + transpose ONCE in the wrapper; store in the
    # matmul dtype so the materialized (D,C) copy and the W stream are half-width.
    w32 = weight.astype(jnp.float32)
    w_inv = lax.rsqrt(jnp.maximum(jnp.sum(w32 * w32, axis=1, keepdims=True),
                                  eps * eps))
    w_n_t = (w32 * w_inv).T.astype(mm_dtype)                       # (D, C)

    # x: row-normalize ONCE in the wrapper (was recomputed per C tile in-kernel);
    # reuse the rsqrt for ||x|| (NormOfFeature).
    x32 = x.astype(jnp.float32)
    ssq = jnp.sum(x32 * x32, axis=1, keepdims=True)
    x_inv = lax.rsqrt(jnp.maximum(ssq, eps * eps))                 # 1/max(||x||,eps)
    x_n = (x32 * x_inv).astype(mm_dtype)                           # (B, D)
    x_norm = (ssq * x_inv).astype(jnp.float32)                     # ||x||  (B, 1)

    labeled = label is not None
    if labeled:
        # Runtime scalar -> works with traced iter_count, no per-step recompile.
        lamb = jnp.maximum(
            jnp.float32(lambda_min),
            jnp.float32(base) *
            (1.0 + jnp.float32(gamma) * jnp.asarray(iter_count, jnp.float32))
            ** jnp.float32(-power))
        scale = (1.0 / (1.0 + lamb)).reshape(1, 1).astype(jnp.float32)
        label2d = jnp.asarray(label).reshape(B, 1).astype(jnp.int32)
    else:
        scale = jnp.zeros((1, 1), jnp.float32)
        label2d = jnp.full((B, 1), -1, jnp.int32)

    if B_pad != B:
        pad = ((0, B_pad - B), (0, 0))
        x_n = jnp.pad(x_n, pad)
        x_norm = jnp.pad(x_norm, pad)
        label2d = jnp.pad(label2d, pad, constant_values=-1)
    if C_pad != C:
        w_n_t = jnp.pad(w_n_t, ((0, 0), (0, C_pad - C)))

    kernel = functools.partial(_sphere_kernel, m=m, tc=TC, labeled=labeled)

    # VMEM: double-buffered tiles + f32 temporaries + headroom, capped at 75%
    # of physical VMEM (48 MiB on v7x's 64 MiB, ~96 MiB on v5e/v6e's 128 MiB).
    tiles = (2 * TB * D * mm_bytes + 2 * D * TC * mm_bytes
             + 2 * TB * TC * 4 + 3 * TB * TC * 4 + 4 * TB * 8)
    vmem_limit = int(min(0.75 * vmem_cap, tiles + 16 * _MiB))

    # Grid: C outer / B inner.  Leading (largest) parallel axis is C, so v7x's
    # two TensorCores split it even when B fits a single tile; the (D,TC)
    # weight tile is fetched once per C step and stays resident across the
    # inner B loop (x tile re-fetch is skipped when there is only one B tile).
    grid = (C_pad // TC, B_pad // TB)
    out = pl.pallas_call(
        kernel,
        out_shape=jax.ShapeDtypeStruct((B_pad, C_pad), jnp.float32),
        grid=grid,
        in_specs=[
            pl.BlockSpec(memory_space=pltpu.MemorySpace.SMEM),   # 1/(1+lambda)
            pl.BlockSpec((TB, D), lambda c, b: (b, 0)),          # normalized x
            pl.BlockSpec((D, TC), lambda c, b: (0, c)),          # normalized W^T
            pl.BlockSpec((TB, 1), lambda c, b: (b, 0)),          # ||x||
            pl.BlockSpec((TB, 1), lambda c, b: (b, 0)),          # labels
        ],
        out_specs=pl.BlockSpec((TB, TC), lambda c, b: (b, c)),
        compiler_params=pltpu.CompilerParams(
            dimension_semantics=("parallel", "parallel"),
            vmem_limit_bytes=vmem_limit,
        ),
    )(scale, x_n, w_n_t, x_norm, label2d)

    return out[:B, :C]


def _reference(x, weight, label, *, m=4, iter_count=1,
               base=1000.0, gamma=0.12, power=1, lambda_min=5.0):
    """Pure-JAX reference mirroring the PyTorch forward (labeled branch)."""
    lamb = max(lambda_min, base * (1.0 + gamma * iter_count) ** (-power))
    eps = 1e-12
    xn = x / jnp.maximum(jnp.linalg.norm(x, axis=1, keepdims=True), eps)
    wn = weight / jnp.maximum(jnp.linalg.norm(weight, axis=1, keepdims=True), eps)
    cos = jnp.clip(xn @ wn.T, -1.0, 1.0)
    mlambda = [
        lambda c: jnp.ones_like(c),
        lambda c: c,
        lambda c: 2.0 * c ** 2 - 1.0,
        lambda c: 4.0 * c ** 3 - 3.0 * c,
        lambda c: 8.0 * c ** 4 - 8.0 * c ** 2 + 1.0,
        lambda c: 16.0 * c ** 5 - 20.0 * c ** 3 + 5.0 * c,
    ]
    cos_m = mlambda[m](cos)
    theta = jnp.arccos(cos)
    k = jnp.floor(m * theta / 3.14159265)
    sign = 1.0 - 2.0 * (k - 2.0 * jnp.floor(0.5 * k))   # (-1)**k
    phi = sign * cos_m - 2.0 * k
    nof = jnp.linalg.norm(x, axis=1, keepdims=True)
    one_hot = jax.nn.one_hot(label, cos.shape[1], dtype=cos.dtype)
    return (one_hot * (phi - cos) / (1.0 + lamb) + cos) * nof


if __name__ == "__main__":
    key = jax.random.PRNGKey(0)
    m = 4

    # --- Test 1: single-tile shapes, f32 matmul path (tight tolerance) -------
    B, D, C = 8, 32, 16
    kx, kw, kl, kx2, kw2, kl2 = jax.random.split(key, 6)
    x = jax.random.normal(kx, (B, D), dtype=jnp.float32)
    bound = math.sqrt(6.0 / (D + C))   # deterministic xavier_uniform-style init
    weight = jax.random.uniform(kw, (C, D), dtype=jnp.float32,
                                minval=-bound, maxval=bound)
    label = jax.random.randint(kl, (B,), 0, C, dtype=jnp.int32)

    out = jax.block_until_ready(sphere_product(
        x, weight, label, m=m, iter_count=1, matmul_dtype=jnp.float32))
    ref = _reference(x, weight, label, m=m, iter_count=1)
    assert out.shape == (B, C)
    assert jnp.allclose(out, ref, rtol=1e-4, atol=1e-4), "mismatch (test 1, f32)"

    # --- Test 2: multi C-tile path + padding, f32 matmul path -----------------
    B2, D2, C2 = 16, 64, 1000
    x2 = jax.random.normal(kx2, (B2, D2), dtype=jnp.float32)
    bound2 = math.sqrt(6.0 / (D2 + C2))
    weight2 = jax.random.uniform(kw2, (C2, D2), dtype=jnp.float32,
                                 minval=-bound2, maxval=bound2)
    label2 = jax.random.randint(kl2, (B2,), 0, C2, dtype=jnp.int32)

    out2 = jax.block_until_ready(sphere_product(
        x2, weight2, label2, m=m, iter_count=3, matmul_dtype=jnp.float32))
    ref2 = _reference(x2, weight2, label2, m=m, iter_count=3)
    assert out2.shape == (B2, C2)
    assert jnp.allclose(out2, ref2, rtol=1e-4, atol=1e-4), "mismatch (test 2, f32)"

    # --- Test 3: default bf16 MXU path (f32 accumulation, f32 epilogue) -------
    out3 = jax.block_until_ready(sphere_product(
        x2, weight2, label2, m=m, iter_count=3))
    assert out3.shape == (B2, C2)
    assert jnp.allclose(out3, ref2, atol=2e-1), "mismatch (test 3, bf16 matmul)"

    # --- Test 4: unlabeled (inference) branch: plain normalized cosine --------
    out4 = jax.block_until_ready(sphere_product(
        x2, weight2, None, m=m, matmul_dtype=jnp.float32))
    xn = x2 / jnp.maximum(jnp.linalg.norm(x2, axis=1, keepdims=True), 1e-12)
    wn = weight2 / jnp.maximum(jnp.linalg.norm(weight2, axis=1, keepdims=True), 1e-12)
    ref4 = xn @ wn.T
    assert out4.shape == (B2, C2)
    assert jnp.allclose(out4, ref4, rtol=1e-4, atol=1e-4), "mismatch (test 4, unlabeled)"

    print("KERNEL_OK")
</pallas_src>

<mosaic_0001>
module attributes {stable_mosaic.version = 11 : i64} {
  func.func @_sphere_kernel(%arg0: i32, %arg1: i32, %arg2: memref<1x1xf32, #tpu.memory_space<smem>>, %arg3: memref<8x32xf32, #tpu.memory_space<vmem>>, %arg4: memref<32x128xf32, #tpu.memory_space<vmem>>, %arg5: memref<8x1xf32, #tpu.memory_space<vmem>>, %arg6: memref<8x1xi32, #tpu.memory_space<vmem>>, %arg7: memref<8x128xf32, #tpu.memory_space<vmem>>) attributes {dimension_semantics = [#tpu.dimension_semantics<parallel>, #tpu.dimension_semantics<parallel>], iteration_bounds = array<i64: 1, 1>, scalar_prefetch = 0 : i64, scratch_operands = 0 : i64, tpu.core_type = #tpu.core_type<tc>, window_params = [{transform_indices = @transform_0, window_bounds = array<i64: 1, 1>}, {transform_indices = @transform_1, window_bounds = array<i64: 8, 32>}, {transform_indices = @transform_2, window_bounds = array<i64: 32, 128>}, {transform_indices = @transform_3, window_bounds = array<i64: 8, 1>}, {transform_indices = @transform_4, window_bounds = array<i64: 8, 1>}, {transform_indices = @transform_5, window_bounds = array<i64: 8, 128>}]} {
    %c0 = arith.constant 0 : index
    %c0_0 = arith.constant 0 : index
    %0 = vector.load %arg3[%c0, %c0_0] : memref<8x32xf32, #tpu.memory_space<vmem>>, vector<8x32xf32>
    %c0_1 = arith.constant 0 : index
    %c0_2 = arith.constant 0 : index
    %1 = vector.load %arg4[%c0_1, %c0_2] : memref<32x128xf32, #tpu.memory_space<vmem>>, vector<32x128xf32>
    %cst = arith.constant dense<0.000000e+00> : vector<8x128xf32>
    %2 = tpu.matmul %0, %1, %cst {dimension_numbers = #tpu.dot_dimension_numbers<[1], [0], [0], [1], [0, 0, 1, 1], [], []>} : vector<8x32xf32>, vector<32x128xf32>, vector<8x128xf32> -> vector<8x128xf32>
    %cst_3 = arith.constant -1.000000e+00 : f32
    %cst_4 = arith.constant 1.000000e+00 : f32
    %3 = vector.broadcast %cst_3 : f32 to vector<8x128xf32>
    %4 = arith.maximumf %3, %2 : vector<8x128xf32>
    %5 = vector.broadcast %cst_4 : f32 to vector<8x128xf32>
    %6 = arith.minimumf %5, %4 : vector<8x128xf32>
    %c0_5 = arith.constant 0 : index
    %c0_6 = arith.constant 0 : index
    %7 = vector.load %arg6[%c0_5, %c0_6] : memref<8x1xi32, #tpu.memory_space<vmem>>, vector<8x1xi32>
    %c128_i32 = arith.constant 128 : i32
    %8 = arith.muli %arg0, %c128_i32 : i32
    %9 = vector.broadcast %8 : i32 to vector<8x1xi32>
    %10 = arith.subi %7, %9 : vector<8x1xi32>
    %11 = tpu.iota {dimensions = array<i32: 1>} : vector<1x128xi32>
    %12 = vector.broadcast %11 : vector<1x128xi32> to vector<8x128xi32>
    %13 = vector.broadcast %10 : vector<8x1xi32> to vector<8x128xi32>
    %14 = arith.cmpi eq, %12, %13 : vector<8x128xi32>
    %cst_7 = arith.constant 0.000000e+00 : f32
    %15 = vector.broadcast %cst_7 : f32 to vector<8x128xf32>
    %16 = arith.select %14, %6, %15 : vector<8x128xi1>, vector<8x128xf32>
    %cst_8 = arith.constant dense<0.000000e+00> : vector<8xf32>
    %17 = vector.multi_reduction <add>, %16, %cst_8 [1] : vector<8x128xf32> to vector<8xf32>
    %18 = vector.shape_cast %17 : vector<8xf32> to vector<8x1xf32>
    %19 = arith.mulf %18, %18 : vector<8x1xf32>
    %cst_9 = arith.constant 8.000000e+00 : f32
    %20 = vector.broadcast %cst_9 : f32 to vector<8x1xf32>
    %21 = arith.mulf %20, %19 : vector<8x1xf32>
    %cst_10 = arith.constant 8.000000e+00 : f32
    %22 = vector.broadcast %cst_10 : f32 to vector<8x1xf32>
    %23 = arith.subf %21, %22 : vector<8x1xf32>
    %24 = arith.mulf %23, %19 : vector<8x1xf32>
    %cst_11 = arith.constant 1.000000e+00 : f32
    %25 = vector.broadcast %cst_11 : f32 to vector<8x1xf32>
    %26 = arith.addf %24, %25 : vector<8x1xf32>
    %cst_12 = arith.constant 0.000000e+00 : f32
    %27 = vector.broadcast %cst_12 : f32 to vector<8x1xf32>
    %cst_13 = arith.constant 0.707106769 : f32
    %28 = vector.broadcast %cst_13 : f32 to vector<8x1xf32>
    %29 = arith.cmpf ole, %18, %28 : vector<8x1xf32>
    %30 = arith.extui %29 : vector<8x1xi1> to vector<8x1xi32>
    %31 = arith.sitofp %30 : vector<8x1xi32> to vector<8x1xf32>
    %32 = arith.addf %27, %31 : vector<8x1xf32>
    %cst_14 = arith.constant 6.12323426E-17 : f32
    %33 = vector.broadcast %cst_14 : f32 to vector<8x1xf32>
    %34 = arith.cmpf ole, %18, %33 : vector<8x1xf32>
    %35 = arith.extui %34 : vector<8x1xi1> to vector<8x1xi32>
    %36 = arith.sitofp %35 : vector<8x1xi32> to vector<8x1xf32>
    %37 = arith.addf %32, %36 : vector<8x1xf32>
    %cst_15 = arith.constant -0.707106769 : f32
    %38 = vector.broadcast %cst_15 : f32 to vector<8x1xf32>
    %39 = arith.cmpf ole, %18, %38 : vector<8x1xf32>
    %40 = arith.extui %39 : vector<8x1xi1> to vector<8x1xi32>
    %41 = arith.sitofp %40 : vector<8x1xi32> to vector<8x1xf32>
    %42 = arith.addf %37, %41 : vector<8x1xf32>
    %cst_16 = arith.constant -1.000000e+00 : f32
    %43 = vector.broadcast %cst_16 : f32 to vector<8x1xf32>
    %44 = arith.cmpf ole, %18, %43 : vector<8x1xf32>
    %45 = arith.extui %44 : vector<8x1xi1> to vector<8x1xi32>
    %46 = arith.sitofp %45 : vector<8x1xi32> to vector<8x1xf32>
    %47 = arith.addf %42, %46 : vector<8x1xf32>
    %cst_17 = arith.constant 5.000000e-01 : f32
    %48 = vector.broadcast %cst_17 : f32 to vector<8x1xf32>
    %49 = arith.mulf %48, %47 : vector<8x1xf32>
    %50 = math.floor %49 : vector<8x1xf32>
    %cst_18 = arith.constant 2.000000e+00 : f32
    %51 = vector.broadcast %cst_18 : f32 to vector<8x1xf32>
    %52 = arith.mulf %51, %50 : vector<8x1xf32>
    %53 = arith.subf %47, %52 : vector<8x1xf32>
    %cst_19 = arith.constant 2.000000e+00 : f32
    %54 = vector.broadcast %cst_19 : f32 to vector<8x1xf32>
    %55 = arith.mulf %54, %53 : vector<8x1xf32>
    %cst_20 = arith.constant 1.000000e+00 : f32
    %56 = vector.broadcast %cst_20 : f32 to vector<8x1xf32>
    %57 = arith.subf %56, %55 : vector<8x1xf32>
    %58 = arith.mulf %57, %26 : vector<8x1xf32>
    %cst_21 = arith.constant 2.000000e+00 : f32
    %59 = vector.broadcast %cst_21 : f32 to vector<8x1xf32>
    %60 = arith.mulf %59, %47 : vector<8x1xf32>
    %61 = arith.subf %58, %60 : vector<8x1xf32>
    %c0_22 = arith.constant 0 : index
    %c0_23 = arith.constant 0 : index
    %62 = vector.load %arg5[%c0_22, %c0_23] : memref<8x1xf32, #tpu.memory_space<vmem>>, vector<8x1xf32>
    %63 = arith.subf %61, %18 : vector<8x1xf32>
    %c0_24 = arith.constant 0 : index
    %c0_25 = arith.constant 0 : index
    %64 = memref.load %arg2[%c0_24, %c0_25] : memref<1x1xf32, #tpu.memory_space<smem>>
    %65 = vector.broadcast %64 : f32 to vector<8x1xf32>
    %66 = arith.mulf %63, %65 : vector<8x1xf32>
    %67 = arith.mulf %66, %62 : vector<8x1xf32>
    %68 = vector.broadcast %62 : vector<8x1xf32> to vector<8x128xf32>
    %69 = arith.mulf %6, %68 : vector<8x128xf32>
    %cst_26 = arith.constant 0.000000e+00 : f32
    %70 = vector.shape_cast %67 : vector<8x1xf32> to vector<8x1xf32>
    %71 = vector.broadcast %70 : vector<8x1xf32> to vector<8x128xf32>
    %72 = vector.broadcast %cst_26 : f32 to vector<8x128xf32>
    %73 = arith.select %14, %71, %72 : vector<8x128xi1>, vector<8x128xf32>
    %74 = arith.addf %69, %73 : vector<8x128xf32>
    %c0_27 = arith.constant 0 : index
    %c0_28 = arith.constant 0 : index
    %75 = vector.load %arg7[%c0_27, %c0_28] : memref<8x128xf32, #tpu.memory_space<vmem>>, vector<8x128xf32>
    tpu.vector_store %arg7[%c0_27, %c0_28], %74 {strides = array<i32>} : memref<8x128xf32, #tpu.memory_space<vmem>>, vector<8x128xf32>,
    return
  }
  func.func @transform_0(%arg0: i32, %arg1: i32) -> (i32, i32) {
    %c0_i32 = arith.constant 0 : i32
    %c0_i32_0 = arith.constant 0 : i32
    %c0_i32_1 = arith.constant 0 : i32
    return %c0_i32, %c0_i32_0 : i32, i32
  }
  func.func @transform_1(%arg0: i32, %arg1: i32) -> (i32, i32) {
    %c0_i32 = arith.constant 0 : i32
    %c0_i32_0 = arith.constant 0 : i32
    return %arg1, %c0_i32 : i32, i32
  }
  func.func @transform_2(%arg0: i32, %arg1: i32) -> (i32, i32) {
    %c0_i32 = arith.constant 0 : i32
    %c0_i32_0 = arith.constant 0 : i32
    return %c0_i32, %arg0 : i32, i32
  }
  func.func @transform_3(%arg0: i32, %arg1: i32) -> (i32, i32) {
    %c0_i32 = arith.constant 0 : i32
    %c0_i32_0 = arith.constant 0 : i32
    return %arg1, %c0_i32 : i32, i32
  }
  func.func @transform_4(%arg0: i32, %arg1: i32) -> (i32, i32) {
    %c0_i32 = arith.constant 0 : i32
    %c0_i32_0 = arith.constant 0 : i32
    return %arg1, %c0_i32 : i32, i32
  }
  func.func @transform_5(%arg0: i32, %arg1: i32) -> (i32, i32) {
    %c0_i32 = arith.constant 0 : i32
    return %arg1, %arg0 : i32, i32
  }
}

</mosaic_0001>

<bundles_post_ra>
// kernel: tpu_custom_call.1
= control target key start
LH: loop header
LB: loop body
LE: loop exit
PB: predicated region body
PF: predicated region fallthrough
CT: control target
= control target key end

     0   :  { %11 = vsyncpa [#allocation4], 0  ;;  %s328_s0 = inlined_call_operand.<no memory space> [shape: f32[1,1], index: 0, kind: input, shape index: {}]   ;;  %s329_s1 = inlined_call_operand.vmem [shape: f32[8,32], index: 1, kind: input, shape index: {}]   ;;  %s330_s2 = inlined_call_operand.hbm [shape: f32[32,128], index: 2, kind: input, shape index: {}]   ;;  %s331_s3 = inlined_call_operand.vmem [shape: f32[8,1], index: 3, kind: input, shape index: {}]   ;;  %s332_s4 = inlined_call_operand.vmem [shape: s32[8,1], index: 4, kind: input, shape index: {}]   ;;  %s333_s5 = inlined_call_operand.hbm [shape: f32[8,128], index: 5, kind: output, shape index: {}]  }
   0x1   :  { %12 = vsyncpa [#allocation5], 0  ;;  %s271_s18 = smov [#allocation3]  }
   0x2   :  { %s22_s19 = sshll.u32 %s271_s18, 4  ;;  %s23_s19 = int_to_ptr.vmem [resolvable:$true] %s22_s19 }
   0x3   :  { %s235_s20 = scalar_lea.vmem %s23_s19, 512  ;;  %p240_p1 = scmp.lt.s32.totalorder %s23_s19, %s23_s19 }
   0x4   :  { %p236_p0 = scmp.ne.s32.totalorder %s23_s19, %s235_s20  ;;  %p241_p2 = scmp.lt.s32.totalorder %s235_s20, %s235_s20 }
   0x6   :  { %p242_p3 = por %p241_p2, %p240_p1 }
   0x8   :  { %p243_p4 = pnand %p242_p3, %p236_p0 }
   0xa   :  { %246 = shalt.err (!%p243_p4)
}
   0xb   :  { %s272_s21 = smov 128   ;;  %s273_s22 = smov 8  }
   0xc   :  { %28 = dma.hbm_to_vmem [thread:$0]  %s330_s2, 512, %s23_s19, [#allocation4], %s272_s21, %s272_s21, %s273_s22  }
   0xd   :  { %267 = dma.done.wait [#allocation4], 512  }
   0xe   :  { %268 = vsyncadd [#allocation4], 4294966784  ;;  %v274_v0 = vmov 0.0   ;;  %vm275_vm0 = vmmov 0   ;;  %v276_v1 = vmov 0   ;;  %v40_v2 = vld [vmem:[#allocation3 + $0x18] sm:$0xff]  ;;  %v121_v9 = vlaneseq }
   0xf   :  { %207 = vmatprep.subr.mxu0 %v274_v0  ;;  %215 = vmatprep.mubr.msk.f32.mxu0 %vm275_vm0, %v274_v0  ;;  %v39_v3 = vld [vmem:[#allocation3 + $0x10] sm:$0xff]  ;;  %v117_v4 = vld [vmem:[%s332_s4] sm:$0xff]  ;;  %v38_v5 = vld [vmem:[#allocation3 + $0x8] sm:$0xff]  ;;  %vm41_vm1 = vcmask 261120   ;;  %v163_v38 = vstv %s328_s0  ;;  %s277_s4 = smov [#allocation6]  }
  0x10   :  { %225 = vset.pattern.permute.xlu0 %v276_v1  ;;  %226 = vset.pattern.permute.xlu1 %v276_v1  ;;  %v160_v6 = vld [vmem:[%s331_s3] sm:$0xff]  ;;  %v122_v10 = vand.u32 127, %v121_v9  ;;  %s186_s30 = sshll.u32 %s277_s4, 4  ;;  %s187_s30 = int_to_ptr.vmem [resolvable:$true] %s186_s30 }
  0x11   :  { %208 = vmatpush3.msra.mxu0 %v40_v2  ;;  %124 = vperm.xlu0 %225, %v117_v4   ;;  %v37_v7 = vld [vmem:[#allocation3] sm:$0xff]  ;;  %s247_s6 = scalar_lea.vmem %s187_s30, 128  ;;  %p252_p6 = scmp.lt.s32.totalorder %s187_s30, %s187_s30 }
  0x12   :  { %209 = vmatprep.subr.mxu0 %v274_v0  ;;  %168 = vperm.xlu1 %226, %v160_v6   ;;  %v36_v8 = vld [vmem:[%s329_s1] sm:$0xff]  ;;  %p248_p5 = scmp.ne.s32.totalorder %s187_s30, %s247_s6  ;;  %p253_p7 = scmp.lt.s32.totalorder %s247_s6, %s247_s6 }
  0x13   :  { %210 = vmatpush3.msra.mxu0 %v39_v3 }
  0x14   :  { %211 = vmatprep.subr.mxu0 %v274_v0  ;;  %p254_p8 = por %p253_p7, %p252_p6 }
  0x15   :  { %212 = vmatpush3.msra.mxu0 %v38_v5 }
  0x16   :  { %213 = vmatprep.subr.mxu0 %v274_v0  ;;  %p255_p9 = pnand %p254_p8, %p248_p5 }
  0x17   :  { %214 = vmatpush3.msra.mxu0 %v37_v7 }
  0x18   :  { %216 = vmatmul.mubr.msk.f32.vlgmr.msra.gmra.mxu0 %vm41_vm1, %v36_v8 }
  0x8c   :  { %v125_v11 = vpop.permute.xlu0 %124 }
  0x8d   :  { %vm126_vm2 = vcmp.eq.s32.totalorder %v122_v10, %v125_v11  ;;  %v169_v42 = vpop.permute.xlu1 %168 }
  0xd8   :  { %v111_v12 = vpop.f32.mrf.mxu0 }
  0xd9   :  { %v196_v13 = vclamps-f32 %v111_v12, 1.0 }
  0xda   :  { %v217_v14 = vpop.f32.mrf.mxu0 }
  0xdb   :  { %v127_v15 = vsel %vm126_vm2, %v196_v13, 0.0  ;;  %v171_v43 = vmul.f32 %v196_v13, %v169_v42 }
  0xdc   :  { %128 = vadd.xlane.f32.xlu0 %v127_v15 }
 0x165   :  { %v129_v16 = vpop.xlane.xlu0 %128 }
 0x166   :  { %vm135_vm3 = vcmp.le.f32.partialorder %v129_v16, 0.70710677  ;;  %vm139_vm4 = vcmp.le.f32.partialorder %v129_v16, 6.123234e-17  ;;  %vm143_vm5 = vcmp.le.f32.partialorder %v129_v16, -0.70710677  ;;  %v130_v19 = vmul.f32 %v129_v16, %v129_v16 }
 0x167   :  { %v198_v17 = vsel %vm135_vm3, 1.0, %v274_v0  ;;  %v199_v18 = vsel %vm139_vm4, 1.0, %v274_v0  ;;  %vm147_vm6 = vcmp.le.f32.partialorder %v129_v16, -1.0  ;;  %v200_v21 = vsel %vm143_vm5, 1.0, %v274_v0 }
 0x168   :  { %v142_v20 = vadd.f32 %v199_v18, %v198_v17  ;;  %v201_v23 = vsel %vm147_vm6, 1.0, %v274_v0  ;;  %v131_v24 = vmul.f32 8.0, %v130_v19 }
 0x16a   :  { %v146_v22 = vadd.f32 %v200_v21, %v142_v20  ;;  %v197_v27 = vadd.f32 -8.0, %v131_v24 }
 0x16c   :  { %v150_v25 = vadd.f32 %v201_v23, %v146_v22  ;;  %v133_v30 = vmul.f32 %v197_v27, %v130_v19 }
 0x16e   :  { %v151_v26 = vmul.f32 0.5, %v150_v25  ;;  %v134_v33 = vadd.f32 1.0, %v133_v30  ;;  %v158_v36 = vmul.f32 2.0, %v150_v25 }
 0x170   :  { %v152_v28 = vfloor.f32 %v151_v26 }
 0x172   :  { %v153_v29 = vmul.f32 2.0, %v152_v28 }
 0x174   :  { %v154_v31 = vsub.f32 %v150_v25, %v153_v29 }
 0x176   :  { %v155_v32 = vmul.f32 2.0, %v154_v31 }
 0x178   :  { %v156_v34 = vsub.f32 1.0, %v155_v32 }
 0x17a   :  { %v157_v35 = vmul.f32 %v156_v34, %v134_v33 }
 0x17c   :  { %v159_v37 = vsub.f32 %v157_v35, %v158_v36 }
 0x17e   :  { %v161_v39 = vsub.f32 %v159_v37, %v129_v16 }
 0x180   :  { %v164_v40 = vmul.f32 %v163_v38, %v161_v39 }
 0x182   :  { %v165_v41 = vmul.f32 %v164_v40, %v160_v6 }
 0x184   :  { %174 = vperm.xlu1 %226, %v165_v41  }
 0x1ff   :  { %v175_v44 = vpop.permute.xlu1 %174 }
 0x200   :  { %v177_v45 = vsel %vm126_vm2, %v175_v44, 0.0 }
 0x201   :  { %v178_v46 = vadd.f32 %v177_v45, %v171_v43 }
 0x203   :  { %179 = vst [vmem:[#allocation6] sm:$0xff] %v178_v46 }
 0x204   :  { %258 = shalt.err (!%p255_p9)
}
 0x205   :  { %189 = dma.vmem_to_hbm [thread:$0]  %s187_s30, 128, %s333_s5, [#allocation5]  }
 0x206   :  { %269 = dma.done.wait [#allocation5], 128  }
 0x207   :  { %270 = vsyncadd [#allocation5], 4294967168 }
 0x208   :  { %193 = vsyncpa [#allocation4], 1 }
 0x209   :  { %194 = vsyncpa [#allocation5], 1 }

</bundles_post_ra>
